<compile_context>
chip_gen: v7x
topology: tpu7x:2x2x1
jax: 0.10.0
libtpu: 0.0.40
codegen_flags: <defaults>
</compile_context>

<pallas_src>
import functools

import jax
import jax.numpy as jnp
from jax.experimental import pallas as pl
from jax.experimental.pallas import tpu as pltpu

LRELU_SLOPE = 0.1

# Per perf review: optionally deepen the streamed-A pipeline to 3 buffers to
# hide the DMA bubble at m-tile transitions (sweep on silicon; 2 = default).
_BUFFER_A_DEPTH = 2


def _round_up(x, m):
    return ((x + m - 1) // m) * m


def _pick_m_tile(m, max_tm):
    """Adaptive TM: minimise M padding waste, respect the A-tile VMEM cap."""
    cands = [t for t in (512, 384, 256, 128) if t <= max_tm] or [128]
    if m <= cands[0]:
        tm = _round_up(max(m, 8), 16)       # single tile, <=15 rows of waste
        return tm, tm
    best_tm, best_waste = None, None
    for t in cands:                          # descending -> prefer larger on tie
        waste = _round_up(m, t) - m
        if best_waste is None or waste < best_waste:
            best_tm, best_waste = t, waste
    return best_tm, _round_up(m, best_tm)


# ---------------------------------------------------------------------------
# Pallas kernel: full-K, full-N GEMM block per m step.  bf16 MXU inputs, f32
# accumulation (never leaves VMEM), fused bias + leaky-relu, bf16 output.
# ---------------------------------------------------------------------------
def _matmul_bias_act_kernel(a_ref, b_ref, bias_ref, o_ref, *, apply_lrelu):
    acc = jnp.dot(a_ref[...], b_ref[...], preferred_element_type=jnp.float32)
    acc = acc + bias_ref[...]
    if apply_lrelu:
        acc = jnp.where(acc >= 0, acc, LRELU_SLOPE * acc)
    o_ref[...] = acc.astype(o_ref.dtype)


def pallas_matmul_bias_act(a, b, bias, apply_lrelu):
    """out = leaky_relu(a @ b + bias) as a Pallas TPU kernel.

    a: (M, K), b: (K, N), bias: (N,)  ->  (M, N) bf16.
    Weights stay resident in VMEM (constant index map); A streams over M.
    """
    M, K = a.shape
    _, N = b.shape

    K_pad = _round_up(K, 16)
    N_pad = _round_up(N, 128)

    # Cap the A tile at ~4 MiB so the worst-case footprint (resident B + double
    # buffers) stays around 30 MiB -> fits v7x's 64 MiB VMEM with headroom.
    a_tile_budget = 4 * 1024 * 1024
    max_tm = max(128, ((a_tile_budget // (K_pad * 2)) // 128) * 128)
    TM, M_pad = _pick_m_tile(M, max_tm)

    a_bf = a.astype(jnp.bfloat16)
    if (M_pad, K_pad) != (M, K):
        a_bf = jnp.pad(a_bf, ((0, M_pad - M), (0, K_pad - K)))
    b_bf = b.astype(jnp.bfloat16)
    if (K_pad, N_pad) != (K, N):
        b_bf = jnp.pad(b_bf, ((0, K_pad - K), (0, N_pad - N)))
    bias2 = bias.astype(jnp.float32).reshape(1, N)
    if N_pad != N:
        bias2 = jnp.pad(bias2, ((0, 0), (0, N_pad - N)))

    # VMEM budget (assume 2 buffers per operand) + margin, clamped for safety.
    vmem_bytes = (_BUFFER_A_DEPTH * TM * K_pad * 2   # streamed A (bf16)
                  + 2 * K_pad * N_pad * 2            # resident weights (bf16)
                  + 2 * TM * N_pad * 2               # bf16 output
                  + 2 * N_pad * 4)                   # bias
    vmem_limit = int(min(max(vmem_bytes + 4 * 1024 * 1024, 24 * 1024 * 1024),
                         48 * 1024 * 1024))

    a_kwargs = {}
    if _BUFFER_A_DEPTH != 2:
        a_kwargs["pipeline_mode"] = pl.Buffered(_BUFFER_A_DEPTH)
    a_spec = pl.BlockSpec((TM, K_pad), lambda i: (i, 0), **a_kwargs)

    grid = (M_pad // TM,)
    out = pl.pallas_call(
        functools.partial(_matmul_bias_act_kernel, apply_lrelu=apply_lrelu),
        out_shape=jax.ShapeDtypeStruct((M_pad, N_pad), jnp.bfloat16),
        grid_spec=pltpu.PrefetchScalarGridSpec(
            num_scalar_prefetch=0,
            grid=grid,
            in_specs=[
                a_spec,
                # constant block index -> weights are DMA'd once and stay put
                pl.BlockSpec((K_pad, N_pad), lambda i: (0, 0)),
                pl.BlockSpec((1, N_pad), lambda i: (0, 0)),
            ],
            out_specs=pl.BlockSpec((TM, N_pad), lambda i: (i, 0)),
        ),
        compiler_params=pltpu.CompilerParams(
            dimension_semantics=("parallel",),
            vmem_limit_bytes=vmem_limit,
        ),
    )(a_bf, b_bf, bias2)

    if M_pad != M or N_pad != N:
        out = out[:M, :N]
    return out


def _matmul_bias_act_reference(a, b, bias, apply_lrelu):
    """Pure-JAX reference with the same bf16-in / f32-accum / bf16-out chain."""
    acc = jnp.dot(a.astype(jnp.bfloat16), b.astype(jnp.bfloat16),
                  preferred_element_type=jnp.float32)
    acc = acc + bias.astype(jnp.float32)[None, :]
    if apply_lrelu:
        acc = jnp.where(acc >= 0, acc, LRELU_SLOPE * acc)
    return acc.astype(jnp.bfloat16)


# ---------------------------------------------------------------------------
# Conv2d with (k, 1) kernel / (s, 1) stride / (p, 0) padding, channels-last.
# ---------------------------------------------------------------------------
def conv2d_kx1_nhwc(x, w, b, stride, pad, apply_lrelu, use_pallas=True):
    # x: (B, H, W, C_in) bf16; w: (C_out, C_in, Kh, 1) [PyTorch layout]; b: (C_out,)
    B, H, W, C_in = x.shape
    C_out, _, Kh, _ = w.shape
    x_pad = jnp.pad(x, ((0, 0), (pad, pad), (0, 0), (0, 0)))
    H_out = (H + 2 * pad - Kh) // stride + 1

    # im2col along H only (contiguous stack + reshape, no layout transpose).
    # TODO(synk): replace with in-kernel Kh-tap reduction for stride-1 layers.
    patches = [
        x_pad[:, kh: kh + stride * (H_out - 1) + 1: stride, :, :]
        for kh in range(Kh)
    ]
    p = jnp.stack(patches, axis=3)                    # (B, H_out, W, Kh, C_in)
    a = p.reshape(B * H_out * W, Kh * C_in)

    # weight -> (Kh*C_in, C_out) matching the (kh, c_in) ordering of a's K axis
    wmat = jnp.transpose(w[:, :, :, 0], (2, 1, 0)).reshape(Kh * C_in, C_out)

    if use_pallas:
        out = pallas_matmul_bias_act(a, wmat, b, apply_lrelu)
    else:
        out = _matmul_bias_act_reference(a, wmat, b, apply_lrelu)
    return out.reshape(B, H_out, W, C_out)            # bf16


# ---------------------------------------------------------------------------
# DiscriminatorP / MultiPeriodDiscriminator forward
# ---------------------------------------------------------------------------
def discriminator_p_forward(params, period, x, fmap_layout="NCHW",
                            use_pallas=True):
    # x: (B, C=1, T) as in PyTorch
    B, C, T = x.shape
    if T % period != 0:
        n_pad = period - T % period
        x = jnp.pad(x, ((0, 0), (0, 0), (0, n_pad)), mode="reflect")
        T = T + n_pad
    x = x.reshape(B, C, T // period, period)          # NCHW (PyTorch view)
    x = jnp.transpose(x, (0, 2, 3, 1))                # -> NHWC once (C == 1)
    x = x.astype(jnp.bfloat16)                        # bf16 activation chain

    fmap_nhwc = []
    strides = [3, 3, 3, 3, 1]
    pads = [2, 2, 2, 2, 2]
    for (w, b), s, p in zip(params["convs"], strides, pads):
        x = conv2d_kx1_nhwc(x, w, b, s, p, apply_lrelu=True,
                            use_pallas=use_pallas)
        fmap_nhwc.append(x)
    w, b = params["conv_post"]
    x = conv2d_kx1_nhwc(x, w, b, 1, 1, apply_lrelu=False,
                        use_pallas=use_pallas)
    fmap_nhwc.append(x)

    if fmap_layout.upper() == "NCHW":
        # PyTorch layout (one transpose per fmap, at the very end only).
        fmap = [jnp.transpose(f, (0, 3, 1, 2)) for f in fmap_nhwc]
    else:
        # Perf option (review): feature-matching L1 is layout invariant.
        fmap = fmap_nhwc

    # torch.flatten(x, 1, -1); C_out == 1 so NHWC / NCHW flatten agree.
    out = x.reshape(B, -1).astype(jnp.float32)
    return out, fmap


def multi_period_discriminator_forward(params_list, y, y_hat,
                                       fmap_layout="NCHW", use_pallas=True):
    periods = [2, 3, 5, 7, 11]
    B = y.shape[0]
    # Run y and y_hat through each discriminator as one batch so conv weights
    # are streamed from HBM once per layer per period.
    yy = jnp.concatenate([y, y_hat], axis=0)
    y_d_rs, y_d_gs, fmap_rs, fmap_gs = [], [], [], []
    for period, params in zip(periods, params_list):
        out, fmap = discriminator_p_forward(params, period, yy,
                                            fmap_layout=fmap_layout,
                                            use_pallas=use_pallas)
        y_d_rs.append(out[:B])
        y_d_gs.append(out[B:])
        fmap_rs.append([f[:B] for f in fmap])
        fmap_gs.append([f[B:] for f in fmap])
    return y_d_rs, y_d_gs, fmap_rs, fmap_gs


# ---------------------------------------------------------------------------
# Deterministic parameter init (weight_norm at init == plain conv weights)
# ---------------------------------------------------------------------------
def _init_conv(key, shape):
    wk, bk = jax.random.split(key)
    c_out, c_in, kh, kw = shape
    fan_in = c_in * kh * kw
    scale = 1.0 / jnp.sqrt(jnp.float32(fan_in))
    w = jax.random.uniform(wk, shape, jnp.float32, -scale, scale)
    b = jax.random.uniform(bk, (c_out,), jnp.float32, -scale, scale)
    return w, b


def init_discriminator_p(key, kernel_size=5):
    shapes = [
        (32, 1, kernel_size, 1),
        (128, 32, kernel_size, 1),
        (512, 128, kernel_size, 1),
        (1024, 512, kernel_size, 1),
        (1024, 1024, kernel_size, 1),
    ]
    keys = jax.random.split(key, len(shapes) + 1)
    convs = [_init_conv(k, s) for k, s in zip(keys[:-1], shapes)]
    conv_post = _init_conv(keys[-1], (1, 1024, 3, 1))
    return {"convs": convs, "conv_post": conv_post}


def init_multi_period_discriminator(key):
    keys = jax.random.split(key, 5)
    return [init_discriminator_p(k) for k in keys]


if __name__ == "__main__":
    key = jax.random.PRNGKey(0)
    pkey, yk, ghk = jax.random.split(key, 3)

    params_list = init_multi_period_discriminator(pkey)

    B, C, T = 2, 1, 64
    y = jax.random.normal(yk, (B, C, T), jnp.float32)
    y_hat = jax.random.normal(ghk, (B, C, T), jnp.float32)

    y_d_rs, y_d_gs, fmap_rs, fmap_gs = multi_period_discriminator_forward(
        params_list, y, y_hat
    )
    jax.block_until_ready((y_d_rs, y_d_gs, fmap_rs, fmap_gs))

    # structure / shape sanity checks
    assert len(y_d_rs) == 5 and len(y_d_gs) == 5
    assert all(len(f) == 6 for f in fmap_rs) and all(len(f) == 6 for f in fmap_gs)
    assert all(o.shape[0] == B and o.ndim == 2 for o in y_d_rs + y_d_gs)
    assert all(f.shape[0] == B and f.ndim == 4 for fl in fmap_rs + fmap_gs for f in fl)

    # numerical check of the Pallas GEMM path against a pure-JAX reference
    # that uses the identical bf16-in / f32-accum / bf16-out chain.
    r_y_d_rs, r_y_d_gs, _, _ = multi_period_discriminator_forward(
        params_list, y, y_hat, use_pallas=False
    )
    for got, ref in zip(y_d_rs + y_d_gs, r_y_d_rs + r_y_d_gs):
        g = jnp.asarray(got, jnp.float32)
        r = jnp.asarray(ref, jnp.float32)
        denom = jnp.maximum(jnp.max(jnp.abs(r)), 1e-3)
        rel_err = float(jnp.max(jnp.abs(g - r)) / denom)
        assert rel_err < 5e-2, f"pallas vs reference mismatch: {rel_err}"

    print("KERNEL_OK")
</pallas_src>

<mosaic_0001>
module attributes {stable_mosaic.version = 11 : i64} {
  func.func @_matmul_bias_act_kernel(%arg0: i32, %arg1: memref<96x16xbf16, #tpu.memory_space<vmem>>, %arg2: memref<16x128xbf16, #tpu.memory_space<vmem>>, %arg3: memref<1x128xf32, #tpu.memory_space<vmem>>, %arg4: memref<96x128xbf16, #tpu.memory_space<vmem>>) attributes {dimension_semantics = [#tpu.dimension_semantics<parallel>], iteration_bounds = array<i64: 1>, scalar_prefetch = 0 : i64, scratch_operands = 0 : i64, tpu.core_type = #tpu.core_type<tc>, window_params = [{transform_indices = @transform_0, window_bounds = array<i64: 96, 16>}, {pipeline_mode = #tpu.pipeline_mode<synchronous>, transform_indices = @transform_1, window_bounds = array<i64: 16, 128>}, {pipeline_mode = #tpu.pipeline_mode<synchronous>, transform_indices = @transform_2, window_bounds = array<i64: 1, 128>}, {transform_indices = @transform_3, window_bounds = array<i64: 96, 128>}]} {
    %c0 = arith.constant 0 : index
    %c0_0 = arith.constant 0 : index
    %0 = vector.load %arg1[%c0, %c0_0] : memref<96x16xbf16, #tpu.memory_space<vmem>>, vector<96x16xbf16>
    %c0_1 = arith.constant 0 : index
    %c0_2 = arith.constant 0 : index
    %1 = vector.load %arg2[%c0_1, %c0_2] : memref<16x128xbf16, #tpu.memory_space<vmem>>, vector<16x128xbf16>
    %cst = arith.constant dense<0.000000e+00> : vector<96x128xf32>
    %2 = tpu.matmul %0, %1, %cst {dimension_numbers = #tpu.dot_dimension_numbers<[1], [0], [0], [1], [0, 0, 1, 1], [], []>} : vector<96x16xbf16>, vector<16x128xbf16>, vector<96x128xf32> -> vector<96x128xf32>
    %c0_3 = arith.constant 0 : index
    %c0_4 = arith.constant 0 : index
    %3 = vector.load %arg3[%c0_3, %c0_4] : memref<1x128xf32, #tpu.memory_space<vmem>>, vector<1x128xf32>
    %4 = vector.broadcast %3 : vector<1x128xf32> to vector<96x128xf32>
    %5 = arith.addf %2, %4 : vector<96x128xf32>
    %cst_5 = arith.constant 0.000000e+00 : f32
    %6 = vector.broadcast %cst_5 : f32 to vector<96x128xf32>
    %7 = arith.cmpf oge, %5, %6 : vector<96x128xf32>
    %cst_6 = arith.constant 1.000000e-01 : f32
    %8 = vector.broadcast %cst_6 : f32 to vector<96x128xf32>
    %9 = arith.mulf %8, %5 : vector<96x128xf32>
    %10 = arith.select %7, %5, %9 : vector<96x128xi1>, vector<96x128xf32>
    %11 = arith.truncf %10 : vector<96x128xf32> to vector<96x128xbf16>
    %c0_7 = arith.constant 0 : index
    %c0_8 = arith.constant 0 : index
    %12 = vector.load %arg4[%c0_7, %c0_8] : memref<96x128xbf16, #tpu.memory_space<vmem>>, vector<96x128xbf16>
    tpu.vector_store %arg4[%c0_7, %c0_8], %11 {strides = array<i32>} : memref<96x128xbf16, #tpu.memory_space<vmem>>, vector<96x128xbf16>,
    return
  }
  func.func @transform_0(%arg0: i32) -> (i32, i32) {
    %c0_i32 = arith.constant 0 : i32
    %c0_i32_0 = arith.constant 0 : i32
    return %arg0, %c0_i32 : i32, i32
  }
  func.func @transform_1(%arg0: i32) -> (i32, i32) {
    %c0_i32 = arith.constant 0 : i32
    %c0_i32_0 = arith.constant 0 : i32
    %c0_i32_1 = arith.constant 0 : i32
    return %c0_i32, %c0_i32_0 : i32, i32
  }
  func.func @transform_2(%arg0: i32) -> (i32, i32) {
    %c0_i32 = arith.constant 0 : i32
    %c0_i32_0 = arith.constant 0 : i32
    %c0_i32_1 = arith.constant 0 : i32
    return %c0_i32, %c0_i32_0 : i32, i32
  }
  func.func @transform_3(%arg0: i32) -> (i32, i32) {
    %c0_i32 = arith.constant 0 : i32
    %c0_i32_0 = arith.constant 0 : i32
    return %arg0, %c0_i32 : i32, i32
  }
}

</mosaic_0001>

<bundles_post_ra>
// kernel: tpu_custom_call.1
= control target key start
LH: loop header
LB: loop body
LE: loop exit
PB: predicated region body
PF: predicated region fallthrough
CT: control target
= control target key end

     0   :  { %vm73_vm0 = vcmask 130048   ;;  %s480_s0 = inlined_call_operand.vmem [shape: bf16[96,16], index: 0, kind: input, shape index: {}]   ;;  %s481_s1 = inlined_call_operand.vmem [shape: bf16[16,128], index: 1, kind: input, shape index: {}]   ;;  %s482_s2 = inlined_call_operand.vmem [shape: f32[1,128], index: 2, kind: input, shape index: {}]   ;;  %s483_s3 = inlined_call_operand.hbm [shape: bf16[96,128], index: 3, kind: output, shape index: {}]  }
   0x1   :  { %v384_v0 = vld [vmem:[%s481_s1] sm:$0xff]   ;;  %v385_v1 = vld [vmem:[%s480_s0 + $0x10] sm:$0xff]   ;;  %v386_v2 = vld [vmem:[%s480_s0 + $0x18] sm:$0xff]  }
   0x2   :  { %379 = vmatprep.subr.bf16.mxu1 %v384_v0  ;;  %365 = vmatprep.subr.bf16.mxu0 %v384_v0  ;;  %v387_v3 = vld [vmem:[%s480_s0] sm:$0xff]   ;;  %v388_v4 = vld [vmem:[%s480_s0 + $0x8] sm:$0xff]  }
   0x3   :  { %380 = vmatpush3.bf16.msra.mxu1 %v384_v0  ;;  %371 = vmatprep.mubr.msk.bf16.mxu1 %vm73_vm0, %v385_v1  ;;  %v389_v5 = vld [vmem:[%s480_s0 + $0x20] sm:$0xff]  }
   0x4   :  { %366 = vmatpush3.bf16.msra.mxu0 %v384_v0  ;;  %367 = vmatprep.mubr.msk.bf16.mxu0 %vm73_vm0, %v387_v3 }
   0x6   :  { %372 = vmatmul.mubr.msk.bf16.vlgmr.msra.gmra.mrb[0].mxu1 %vm73_vm0, %v386_v2 }
   0x7   :  { %368 = vmatmul.mubr.msk.bf16.vlgmr.msra.gmra.mrb[0].mxu0 %vm73_vm0, %v388_v4  ;;  %375 = vmatprep.mubr.msk.bf16.mxu1 %vm73_vm0, %v389_v5 }
   0x8   :  { %8 = vsyncpa [#allocation3], 0  ;;  %v390_v6 = vld [vmem:[%s480_s0 + $0x28] sm:$0xff]   ;;  %v285_v7 = vld [vmem:[%s482_s2] ss:$0 sm:$0xff]  ;;  %s415_s0 = smov [#allocation2]  }
   0x9   :  { %s274_s2 = sshll.u32 %s415_s0, 4  ;;  %s275_s2 = int_to_ptr.vmem [resolvable:$true] %s274_s2 }
   0xa   :  { %s391_s27 = scalar_lea.vmem %s275_s2, 768  ;;  %p396_p1 = scmp.lt.s32.totalorder %s275_s2, %s275_s2 }
   0xb   :  { %p392_p0 = scmp.ne.s32.totalorder %s275_s2, %s391_s27  ;;  %p397_p2 = scmp.lt.s32.totalorder %s391_s27, %s391_s27 }
   0xd   :  { %p398_p3 = por %p397_p2, %p396_p1 }
   0xe   :  { %376 = vmatmul.mubr.msk.bf16.gmra.mrb[4].mxu1 %vm73_vm0, %v390_v6 }
   0xf   :  { %p399_p4 = pnand %p398_p3, %p392_p0 }
  0xd9   :  { %v373_v8 = vpop.f32.mrb[0].mxu1 }
  0xda   :  { %v151_v9 = vadd.f32 %v373_v8, %v285_v7  ;;  %v142_v10 = vpop.f32.mrb[1].mxu1  ;;  %v369_v11 = vpop.f32.mrb[0].mxu0 }
  0xdb   :  { %v143_v12 = vadd.f32 %v285_v7, %v142_v10  ;;  %v374_v13 = vpop.f32.mrb[2].mxu1  ;;  %v135_v14 = vadd.f32 %v369_v11, %v285_v7  ;;  %v126_v15 = vpop.f32.mrb[1].mxu0 }
  0xdc   :  { %vm179_vm1 = vcmp.ge.f32.partialorder %v151_v9, 0.0  ;;  %v191_v16 = vmul.f32 0.1, %v151_v9  ;;  %v154_v17 = vadd.f32 %v374_v13, %v285_v7  ;;  %v145_v18 = vpop.f32.mrb[3].mxu1  ;;  %v127_v19 = vadd.f32 %v285_v7, %v126_v15  ;;  %v370_v20 = vpop.f32.mrb[2].mxu0 }
  0xdd   :  { %vm177_vm2 = vcmp.ge.f32.partialorder %v143_v12, 0.0  ;;  %v189_v21 = vmul.f32 0.1, %v143_v12  ;;  %v187_v22 = vmul.f32 0.1, %v135_v14  ;;  %vm175_vm4 = vcmp.ge.f32.partialorder %v135_v14, 0.0 }
  0xde   :  { %vm180_vm3 = vcmp.ge.f32.partialorder %v154_v17, 0.0  ;;  %v192_v23 = vmul.f32 0.1, %v154_v17  ;;  %v146_v24 = vadd.f32 %v285_v7, %v145_v18  ;;  %v129_v25 = vpop.f32.mrb[3].mxu0  ;;  %v203_v26 = vsel %vm179_vm1, %v151_v9, %v191_v16 }
  0xdf   :  { %v201_v27 = vsel %vm177_vm2, %v143_v12, %v189_v21  ;;  %vm173_vm5 = vcmp.ge.f32.partialorder %v127_v19, 0.0  ;;  %v185_v28 = vmul.f32 0.1, %v127_v19  ;;  %v138_v31 = vadd.f32 %v370_v20, %v285_v7 }
  0xe0   :  { %v204_v29 = vsel %vm180_vm3, %v154_v17, %v192_v23  ;;  %vm178_vm6 = vcmp.ge.f32.partialorder %v146_v24, 0.0  ;;  %v190_v30 = vmul.f32 0.1, %v146_v24  ;;  %v199_v33 = vsel %vm175_vm4, %v135_v14, %v187_v22 }
  0xe1   :  { %v341_v32 = vpack.c.bf16 %v204_v29, %v203_v26  ;;  %v197_v34 = vsel %vm173_vm5, %v127_v19, %v185_v28  ;;  %v130_v35 = vadd.f32 %v285_v7, %v129_v25  ;;  %v377_v36 = vpop.f32.mrb[4].mxu1  ;;  %vm176_vm7 = vcmp.ge.f32.partialorder %v138_v31, 0.0 }
  0xe2   :  { %v202_v37 = vsel %vm178_vm6, %v146_v24, %v190_v30  ;;  %v188_v38 = vmul.f32 0.1, %v138_v31  ;;  %v167_v39 = vadd.f32 %v377_v36, %v285_v7  ;;  %v158_v40 = vpop.f32.mrb[5].mxu1 }
  0xe3   :  { %355 = vst [vmem:[#allocation2 + $0x18] sm:$0xff] %v341_v32   ;;  %v336_v41 = vpack.c.bf16 %v202_v37, %v201_v27  ;;  %vm174_vm8 = vcmp.ge.f32.partialorder %v130_v35, 0.0  ;;  %v186_v42 = vmul.f32 0.1, %v130_v35  ;;  %v159_v43 = vadd.f32 %v285_v7, %v158_v40  ;;  %v378_v44 = vpop.f32.mrb[6].mxu1 }
  0xe4   :  { %v200_v45 = vsel %vm176_vm7, %v138_v31, %v188_v38  ;;  %v195_v46 = vmul.f32 0.1, %v167_v39  ;;  %v170_v47 = vadd.f32 %v378_v44, %v285_v7  ;;  %v161_v48 = vpop.f32.mrb[7].mxu1  ;;  %vm183_vm9 = vcmp.ge.f32.partialorder %v167_v39, 0.0 }
  0xe5   :  { %354 = vst [vmem:[#allocation2 + $0x10] sm:$0xff] %v336_v41   ;;  %v331_v49 = vpack.c.bf16 %v200_v45, %v199_v33  ;;  %v198_v50 = vsel %vm174_vm8, %v130_v35, %v186_v42  ;;  %v193_v53 = vmul.f32 0.1, %v159_v43  ;;  %v162_v54 = vadd.f32 %v285_v7, %v161_v48 }
  0xe6   :  { %v326_v51 = vpack.c.bf16 %v198_v50, %v197_v34  ;;  %vm184_vm10 = vcmp.ge.f32.partialorder %v170_v47, 0.0  ;;  %v196_v52 = vmul.f32 0.1, %v170_v47  ;;  %v207_v55 = vsel %vm183_vm9, %v167_v39, %v195_v46 }
  0xe7   :  { %353 = vst [vmem:[#allocation2 + $0x8] sm:$0xff] %v331_v49   ;;  %vm181_vm11 = vcmp.ge.f32.partialorder %v159_v43, 0.0  ;;  %vm182_vm12 = vcmp.ge.f32.partialorder %v162_v54, 0.0  ;;  %v194_v58 = vmul.f32 0.1, %v162_v54 }
  0xe8   :  { %327 = vst [vmem:[#allocation2] sm:$0xff] %v326_v51   ;;  %v208_v56 = vsel %vm184_vm10, %v170_v47, %v196_v52  ;;  %v205_v59 = vsel %vm181_vm11, %v159_v43, %v193_v53 }
  0xe9   :  { %v351_v57 = vpack.c.bf16 %v208_v56, %v207_v55  ;;  %v206_v60 = vsel %vm182_vm12, %v162_v54, %v194_v58 }
  0xea   :  { %v346_v61 = vpack.c.bf16 %v206_v60, %v205_v59 }
  0xeb   :  { %357 = vst [vmem:[#allocation2 + $0x28] sm:$0xff] %v351_v57  }
  0xec   :  { %356 = vst [vmem:[#allocation2 + $0x20] sm:$0xff] %v346_v61  }
  0xed   :  { %402 = shalt.err (!%p399_p4)
}
  0xee   :  { %s403_s30 = scalar_lea.hbm %s483_s3, 768 }
  0xef   :  { %p404_p5 = scmp.ne.s32.totalorder %s483_s3, %s403_s30  ;;  %p407_p6 = scmp.lt.u32.totalorder %s403_s30, %s483_s3 }
  0xf1   :  { %p409_p7 = pnand %p407_p6, %p404_p5 }
  0xf3   :  { %412 = shalt.err (!%p409_p7)
}
  0xf4   :  { %s416_s8 = smov 64   ;;  %s417_s9 = smov 4  }
  0xf5   :  { %280 = dma.vmem_to_hbm [thread:$0]  %s275_s2, 768, %s483_s3, [#allocation3], %s416_s8, %s416_s8, %s417_s9  }
  0xf6   :  { %413 = dma.done.wait [#allocation3], 768  }
  0xf7   :  { %414 = vsyncadd [#allocation3], 4294966528 }
  0xf8   :  { %284 = vsyncpa [#allocation3], 1 }

</bundles_post_ra>
